<compile_context>
chip_gen: v7x
topology: tpu7x:2x2x1
jax: 0.10.0
libtpu: 0.0.40
codegen_flags: <defaults>
</compile_context>

<pallas_src>
import functools

import numpy as np
import jax
import jax.numpy as jnp
from jax import lax
from jax.experimental import pallas as pl
from jax.experimental.pallas import tpu as pltpu


_OUT_DTYPES = {"float32": jnp.float32, "bfloat16": jnp.bfloat16}


# ----------------------------------------------------------------------------- helpers
def _round_up(x, m):
    return ((x + m - 1) // m) * m


def _pad2d(x, rows, cols):
    r, c = x.shape
    if (r, c) == (rows, cols):
        return x
    return jnp.pad(x, ((0, rows - r), (0, cols - c)))


def _pad1(v, n):
    v = v.astype(jnp.float32)
    return v if v.shape[0] == n else jnp.pad(v, (0, n - v.shape[0]))


def _choose_tm(m):
    """M tiling.  Small M -> one maximal tile (each grid step costs ~0.35us of pipeline
    overhead; splitting tiny convs on a single-TC chip is pure overhead).  Large M ->
    largest candidate tile whose padding waste stays under ~6% (this also yields >=2
    parallel M steps so both v7x TensorCores get work)."""
    mp8 = _round_up(m, 8)
    if mp8 <= 512:
        return mp8, mp8
    for tm in (512, 448, 384, 320, 256, 192, 128, 64):
        mp = _round_up(m, tm)
        if mp - m <= max(m // 16, tm // 8):
            return mp, tm
    return _round_up(m, 64), 64


def _choose_tk(k):
    """K tiling.  K <= 1024 -> single K step (whole reduction in one pass).  Larger K ->
    512-deep slices: fills the 2x256^2 MXUs on v6e/v7x, still 128-aligned for v5e."""
    kp = _round_up(k, 128)
    if kp <= 1024:
        return kp, kp
    return _round_up(k, 512), 512


# ----------------------------------------------------------------------------- Pallas kernel
def _make_kernel(tk, act_cols, has_residual, use_scratch):
    """K-tiled matmul with a VMEM-resident RHS and fused epilogue:
         out = act( A @ B + shift [+ residual] )
    BN scale is pre-folded into B, so the epilogue is add-only.
      act_cols: None -> no ReLU; 0 -> ReLU everywhere; >0 -> ReLU only on columns >=
      act_cols (used when conv1(+ReLU) and the un-ReLU'd 1x1 downsample share one matmul).
    If use_scratch is False (f32 output), the accumulator IS the resident output block."""

    def kernel(*refs):
        if has_residual:
            a_ref, b_ref, t_ref, r_ref, o_ref = refs[:5]
        else:
            a_ref, b_ref, t_ref, o_ref = refs[:4]
            r_ref = None
        acc_ref = refs[-1] if use_scratch else o_ref

        k = pl.program_id(1)

        @pl.when(k == 0)
        def _():
            acc_ref[...] = jnp.zeros_like(acc_ref)

        kk = pl.multiple_of(k * tk, tk)
        acc_ref[...] += jnp.dot(a_ref[...], b_ref[pl.ds(kk, tk), :],
                                preferred_element_type=jnp.float32)

        @pl.when(k == pl.num_programs(1) - 1)
        def _():
            y = acc_ref[...] + t_ref[...]
            if has_residual:
                y = y + r_ref[...].astype(jnp.float32)
            if act_cols is not None:
                if act_cols > 0:
                    col = lax.broadcasted_iota(jnp.int32, y.shape, 1)
                    y = jnp.where(col >= act_cols, jnp.maximum(y, 0.0), y)
                else:
                    y = jnp.maximum(y, 0.0)
            o_ref[...] = y.astype(o_ref.dtype)

    return kernel


# ----------------------------------------------------------------------------- cached pallas_call builder
@functools.lru_cache(maxsize=None)
def _matmul_call(mp, kp, np_, tm, tk, act_cols, has_residual, out_dtype):
    use_scratch = out_dtype != "float32"
    kernel = _make_kernel(tk, act_cols, has_residual, use_scratch)

    in_specs = [
        pl.BlockSpec((tm, tk), lambda i, k: (i, k)),    # A: im2col patches (bf16, streamed)
        pl.BlockSpec((kp, np_), lambda i, k: (0, 0)),   # B: scale-folded weights (bf16, resident)
        pl.BlockSpec((1, np_), lambda i, k: (0, 0)),    # BN shift (f32)
    ]
    if has_residual:
        in_specs.append(pl.BlockSpec((tm, np_), lambda i, k: (i, 0)))   # shortcut (bf16)

    scratch = (pltpu.VMEM((tm, np_), jnp.float32),) if use_scratch else ()

    out_bytes = 2 if use_scratch else 4
    vmem_est = (2 * tm * tk * 2                       # A, double-buffered bf16
                + 2 * kp * np_ * 2                    # B (conservatively 2 buffers)
                + 2 * tm * np_ * out_bytes            # output buffers
                + (tm * np_ * 4 if use_scratch else 0)
                + (2 * tm * np_ * 2 if has_residual else 0)
                + 2 * np_ * 4)
    vmem_limit = int(min(48 * 1024 * 1024, max(16 * 1024 * 1024, 2 * vmem_est)))

    return pl.pallas_call(
        kernel,
        out_shape=jax.ShapeDtypeStruct((mp, np_), _OUT_DTYPES[out_dtype]),
        grid=(mp // tm, kp // tk),
        in_specs=in_specs,
        out_specs=pl.BlockSpec((tm, np_), lambda i, k: (i, 0)),
        scratch_shapes=scratch,
        compiler_params=pltpu.CompilerParams(
            dimension_semantics=("parallel", "arbitrary"),
            vmem_limit_bytes=vmem_limit),
    )


# ----------------------------------------------------------------------------- fused conv-as-matmul op
def _im2col(x, kh, kw, stride, padding):
    # TODO(synk): the 3x3 im2col is still materialized by XLA (one bf16 HBM round trip of
    # the 9x-inflated patch matrix); folding the 9-tap gather into the kernel would need
    # element-offset / halo'd block windows (or manual DMA) and is not done here.
    n, h, w, cin = x.shape
    if padding:
        x = jnp.pad(x, ((0, 0), (padding, padding), (padding, padding), (0, 0)))
    hp, wp = h + 2 * padding, w + 2 * padding
    ho = (hp - kh) // stride + 1
    wo = (wp - kw) // stride + 1
    cols = []
    for dy in range(kh):
        for dx in range(kw):
            cols.append(x[:, dy:dy + stride * (ho - 1) + 1:stride,
                          dx:dx + stride * (wo - 1) + 1:stride, :])
    patches = cols[0] if len(cols) == 1 else jnp.concatenate(cols, axis=-1)
    return patches.reshape(n * ho * wo, kh * kw * cin), ho, wo


def _fold_scale(w2d, scale):
    """Fold the BatchNorm scale (gamma/sqrt(var+eps)) into the conv weights in f32,
    before the bf16 cast, so the kernel epilogue only adds the shift."""
    return w2d.astype(jnp.float32) * scale.astype(jnp.float32)[None, :]


def _fused_matmul(a, w2d, shift, *, act_cols, residual=None, out_dtype="float32"):
    """out[:m, :ncols] = act(a @ w2d + shift [+ residual]).  Returns the PADDED (mp, np_)
    result so consumers (e.g. the next conv's residual input) can reuse it without a
    crop -> re-pad round trip.  `residual`, if given, must be bf16, pre-padded to mp rows
    and >= np_ columns (only the first np_ columns are read by the kernel)."""
    m, kdim = a.shape
    ncols = w2d.shape[1]
    mp, tm = _choose_tm(m)
    kp, tk = _choose_tk(kdim)
    np_ = _round_up(ncols, 128)

    a_p = _pad2d(a, mp, kp)                                   # bf16 patches
    b_p = _pad2d(w2d.astype(jnp.bfloat16), kp, np_)           # scale-folded weights
    t_p = _pad2d(shift.astype(jnp.float32).reshape(1, ncols), 1, np_)

    args = [a_p, b_p, t_p]
    if residual is not None:
        assert residual.shape[0] == mp and residual.shape[1] >= np_, \
            (residual.shape, mp, np_)
        args.append(residual)

    call = _matmul_call(mp, kp, np_, tm, tk,
                        None if act_cols is None else int(act_cols),
                        residual is not None, out_dtype)
    return call(*args)


# ----------------------------------------------------------------------------- BasicBlock
def basic_block(x, p, stride):
    """x: NHWC bf16.  Returns NHWC f32."""
    n, h, w, cin = x.shape
    cout = p["conv1_w"].shape[-1]
    npc = _round_up(cout, 128)

    # ---- conv1 (3x3, stride) [+ fused 1x1 downsample shortcut] ------------------------
    a1, ho, wo = _im2col(x, 3, 3, stride, 1)                  # (m, 9*cin) bf16
    m = a1.shape[0]
    mp, _ = _choose_tm(m)

    w1 = _fold_scale(p["conv1_w"].reshape(9 * cin, cout), p["bn1"]["scale"])

    if "down_w" in p:
        # The 1x1/stride-s downsample samples exactly the centre tap of conv1's im2col,
        # so both convs share a single read of the patch matrix:
        #   columns [0, npc)          -> downsample + BN      (no ReLU)  == shortcut
        #   columns [npc, npc + cout) -> conv1 + BN + ReLU                == residual branch
        wd = _fold_scale(p["down_w"].reshape(cin, cout), p["dbn"]["scale"])
        wd_full = jnp.zeros((9 * cin, cout), jnp.float32).at[4 * cin:5 * cin].set(wd)
        w_fused = jnp.concatenate([_pad2d(wd_full, 9 * cin, npc),
                                   _pad2d(w1, 9 * cin, npc)], axis=1)
        t_fused = jnp.concatenate([_pad1(p["dbn"]["shift"], npc),
                                   _pad1(p["bn1"]["shift"], npc)])
        fused = _fused_matmul(a1, w_fused, t_fused, act_cols=npc,
                              out_dtype="bfloat16")            # (mp, 2*npc) bf16
        shortcut = fused                                        # kernel reads cols [0, npc)
        r = fused[:m, npc:npc + cout].reshape(n, ho, wo, cout)
    else:
        out1 = _fused_matmul(a1, w1, p["bn1"]["shift"], act_cols=0,
                             out_dtype="bfloat16")              # (mp, npc) bf16
        r = out1[:m, :cout].reshape(n, ho, wo, cout)
        # identity shortcut (in_chan == out_chan, stride == 1), bf16, pre-padded layout
        shortcut = _pad2d(x.reshape(m, cin), mp, npc)

    # ---- conv2 (3x3, stride 1) + BN + shortcut add + ReLU, all in one epilogue --------
    a2, _, _ = _im2col(r, 3, 3, 1, 1)                           # (m, 9*cout) bf16
    w2 = _fold_scale(p["conv2_w"].reshape(9 * cout, cout), p["bn2"]["scale"])
    out2 = _fused_matmul(a2, w2, p["bn2"]["shift"], act_cols=0,
                         residual=shortcut, out_dtype="float32")
    return out2[:m, :cout].reshape(n, ho, wo, cout)


@functools.partial(jax.jit, static_argnames=("stride",))
def basic_block_forward(x_nchw, params, stride=1):
    # NCHW -> NHWC; activations carried in bf16 (they become bf16 MXU operands anyway,
    # and this halves the im2col patch-matrix HBM traffic).
    x = jnp.transpose(x_nchw, (0, 2, 3, 1)).astype(jnp.bfloat16)
    y = basic_block(x, params, stride)
    return jnp.transpose(y, (0, 3, 1, 2))                       # NHWC -> NCHW, f32


# ----------------------------------------------------------------------------- parameters
class ParamGen:
    def __init__(self, seed=0):
        self._key = jax.random.PRNGKey(seed)
        self._n = 0

    def _k(self):
        self._n += 1
        return jax.random.fold_in(self._key, self._n)

    def conv(self, kh, kw, cin, cout):
        fan_in = kh * kw * cin
        return (jax.random.normal(self._k(), (kh, kw, cin, cout), jnp.float32)
                / np.sqrt(fan_in)).astype(jnp.float32)

    def bn(self, c):
        # inference-mode BatchNorm folded into per-channel scale/shift
        gamma = 1.0 + 0.1 * jax.random.normal(self._k(), (c,), jnp.float32)
        beta = 0.1 * jax.random.normal(self._k(), (c,), jnp.float32)
        mean = 0.1 * jax.random.normal(self._k(), (c,), jnp.float32)
        var = 0.5 + jax.random.uniform(self._k(), (c,), jnp.float32)
        scale = gamma / jnp.sqrt(var + 1e-5)
        shift = beta - mean * scale
        return {"scale": scale, "shift": shift}


def make_basic_block_params(pg, cin, cout, stride=1):
    p = {"conv1_w": pg.conv(3, 3, cin, cout), "bn1": pg.bn(cout),
         "conv2_w": pg.conv(3, 3, cout, cout), "bn2": pg.bn(cout)}
    if cin != cout or stride != 1:
        p["down_w"] = pg.conv(1, 1, cin, cout)
        p["dbn"] = pg.bn(cout)
    return p


# ----------------------------------------------------------------------------- pure-JAX reference (validation)
def _conv_ref(x, w, stride, padding):
    return jax.lax.conv_general_dilated(
        x, w, window_strides=(stride, stride),
        padding=((padding, padding), (padding, padding)),
        dimension_numbers=("NHWC", "HWIO", "NHWC"))


def basic_block_ref(x_nchw, p, stride):
    x = jnp.transpose(x_nchw, (0, 2, 3, 1)).astype(jnp.float32)
    r = _conv_ref(x, p["conv1_w"], stride, 1)
    r = jnp.maximum(r * p["bn1"]["scale"] + p["bn1"]["shift"], 0.0)
    r = _conv_ref(r, p["conv2_w"], 1, 1)
    r = r * p["bn2"]["scale"] + p["bn2"]["shift"]
    if "down_w" in p:
        s = _conv_ref(x, p["down_w"], stride, 0)
        s = s * p["dbn"]["scale"] + p["dbn"]["shift"]
    else:
        s = x
    out = jnp.maximum(s + r, 0.0)
    return jnp.transpose(out, (0, 3, 1, 2))


# ----------------------------------------------------------------------------- main
if __name__ == "__main__":
    pg = ParamGen(seed=0)
    # block 1: in_chan != out_chan, stride=2 -> downsample (1x1 conv + BN) shortcut path
    p1 = make_basic_block_params(pg, 8, 16, stride=2)
    # block 2: in_chan == out_chan, stride=1 -> identity shortcut path
    p2 = make_basic_block_params(pg, 16, 16, stride=1)

    x = jax.random.normal(jax.random.PRNGKey(0), (2, 8, 16, 16), jnp.float32)  # NCHW

    y1 = basic_block_forward(x, p1, stride=2)
    y2 = basic_block_forward(y1, p2, stride=1)
    y1, y2 = jax.block_until_ready((y1, y2))

    assert y1.shape == (2, 16, 8, 8), y1.shape
    assert y2.shape == (2, 16, 8, 8), y2.shape
    assert bool(jnp.isfinite(y1).all()) and bool(jnp.isfinite(y2).all())

    # numerical check against an f32 reference (loose tol: bf16 MXU operands / shortcut)
    r1 = basic_block_ref(x, p1, 2)
    r2 = basic_block_ref(y1, p2, 1)
    for got, ref in ((y1, r1), (y2, r2)):
        tol = 5e-2 * float(jnp.max(jnp.abs(ref))) + 1e-2
        err = float(jnp.max(jnp.abs(got - ref)))
        assert err <= tol, (err, tol)

    print("KERNEL_OK")
</pallas_src>

<mosaic_0001>
module attributes {stable_mosaic.version = 11 : i64} {
  func.func @kernel(%arg0: i32, %arg1: i32, %arg2: memref<128x128xbf16, #tpu.memory_space<vmem>>, %arg3: memref<128x256xbf16, #tpu.memory_space<vmem>>, %arg4: memref<1x256xf32, #tpu.memory_space<vmem>>, %arg5: memref<128x256xbf16, #tpu.memory_space<vmem>>, %arg6: memref<128x256xf32, #tpu.memory_space<vmem>>) attributes {dimension_semantics = [#tpu.dimension_semantics<parallel>, #tpu.dimension_semantics<arbitrary>], iteration_bounds = array<i64: 1, 1>, scalar_prefetch = 0 : i64, scratch_operands = 1 : i64, tpu.core_type = #tpu.core_type<tc>, window_params = [{transform_indices = @transform_0, window_bounds = array<i64: 128, 128>}, {pipeline_mode = #tpu.pipeline_mode<synchronous>, transform_indices = @transform_1, window_bounds = array<i64: 128, 256>}, {pipeline_mode = #tpu.pipeline_mode<synchronous>, transform_indices = @transform_2, window_bounds = array<i64: 1, 256>}, {transform_indices = @transform_3, window_bounds = array<i64: 128, 256>}]} {
    %c0_i32 = arith.constant 0 : i32
    %0 = arith.cmpi eq, %arg1, %c0_i32 : i32
    %1 = arith.extui %0 : i1 to i32
    %c0_i32_0 = arith.constant 0 : i32
    %2 = arith.cmpi ne, %1, %c0_i32_0 : i32
    scf.if %2 {
      %cst_9 = arith.constant 0.000000e+00 : f32
      %15 = vector.broadcast %cst_9 : f32 to vector<128x256xf32>
      %c0_10 = arith.constant 0 : index
      %c0_11 = arith.constant 0 : index
      %16 = vector.load %arg6[%c0_10, %c0_11] : memref<128x256xf32, #tpu.memory_space<vmem>>, vector<128x256xf32>
      tpu.vector_store %arg6[%c0_10, %c0_11], %15 {strides = array<i32>} : memref<128x256xf32, #tpu.memory_space<vmem>>, vector<128x256xf32>,
    } else {
    }
    %c128_i32 = arith.constant 128 : i32
    %3 = arith.muli %arg1, %c128_i32 : i32
    %4 = tpu.assume_multiple %3, 128 : i32
    %c0 = arith.constant 0 : index
    %c0_1 = arith.constant 0 : index
    %5 = vector.load %arg6[%c0, %c0_1] : memref<128x256xf32, #tpu.memory_space<vmem>>, vector<128x256xf32>
    %c0_2 = arith.constant 0 : index
    %c0_3 = arith.constant 0 : index
    %6 = vector.load %arg2[%c0_2, %c0_3] : memref<128x128xbf16, #tpu.memory_space<vmem>>, vector<128x128xbf16>
    %7 = arith.index_cast %4 : i32 to index
    %c0_4 = arith.constant 0 : index
    %8 = vector.load %arg3[%7, %c0_4] : memref<128x256xbf16, #tpu.memory_space<vmem>>, vector<128x256xbf16>
    %cst = arith.constant dense<0.000000e+00> : vector<128x256xf32>
    %9 = tpu.matmul %6, %8, %cst {dimension_numbers = #tpu.dot_dimension_numbers<[1], [0], [0], [1], [0, 0, 1, 1], [], []>} : vector<128x128xbf16>, vector<128x256xbf16>, vector<128x256xf32> -> vector<128x256xf32>
    %10 = arith.addf %5, %9 : vector<128x256xf32>
    %c0_5 = arith.constant 0 : index
    %c0_6 = arith.constant 0 : index
    %11 = vector.load %arg6[%c0_5, %c0_6] : memref<128x256xf32, #tpu.memory_space<vmem>>, vector<128x256xf32>
    tpu.vector_store %arg6[%c0_5, %c0_6], %10 {strides = array<i32>} : memref<128x256xf32, #tpu.memory_space<vmem>>, vector<128x256xf32>,
    %c0_i32_7 = arith.constant 0 : i32
    %12 = arith.cmpi eq, %arg1, %c0_i32_7 : i32
    %13 = arith.extui %12 : i1 to i32
    %c0_i32_8 = arith.constant 0 : i32
    %14 = arith.cmpi ne, %13, %c0_i32_8 : i32
    scf.if %14 {
      %c0_9 = arith.constant 0 : index
      %c0_10 = arith.constant 0 : index
      %15 = vector.load %arg6[%c0_9, %c0_10] : memref<128x256xf32, #tpu.memory_space<vmem>>, vector<128x256xf32>
      %c0_11 = arith.constant 0 : index
      %c0_12 = arith.constant 0 : index
      %16 = vector.load %arg4[%c0_11, %c0_12] : memref<1x256xf32, #tpu.memory_space<vmem>>, vector<1x256xf32>
      %17 = vector.broadcast %16 : vector<1x256xf32> to vector<128x256xf32>
      %18 = arith.addf %15, %17 : vector<128x256xf32>
      %19 = tpu.iota {dimensions = array<i32: 1>} : vector<128x256xi32>
      %c128_i32_13 = arith.constant 128 : i32
      %20 = vector.broadcast %c128_i32_13 : i32 to vector<128x256xi32>
      %21 = arith.cmpi sge, %19, %20 : vector<128x256xi32>
      %cst_14 = arith.constant 0.000000e+00 : f32
      %22 = vector.broadcast %cst_14 : f32 to vector<128x256xf32>
      %23 = arith.maximumf %18, %22 : vector<128x256xf32>
      %24 = arith.select %21, %23, %18 : vector<128x256xi1>, vector<128x256xf32>
      %25 = arith.truncf %24 : vector<128x256xf32> to vector<128x256xbf16>
      %c0_15 = arith.constant 0 : index
      %c0_16 = arith.constant 0 : index
      %26 = vector.load %arg5[%c0_15, %c0_16] : memref<128x256xbf16, #tpu.memory_space<vmem>>, vector<128x256xbf16>
      tpu.vector_store %arg5[%c0_15, %c0_16], %25 {strides = array<i32>} : memref<128x256xbf16, #tpu.memory_space<vmem>>, vector<128x256xbf16>,
    } else {
    }
    return
  }
  func.func @transform_0(%arg0: i32, %arg1: i32) -> (i32, i32) {
    %c0_i32 = arith.constant 0 : i32
    return %arg0, %arg1 : i32, i32
  }
  func.func @transform_1(%arg0: i32, %arg1: i32) -> (i32, i32) {
    %c0_i32 = arith.constant 0 : i32
    %c0_i32_0 = arith.constant 0 : i32
    %c0_i32_1 = arith.constant 0 : i32
    return %c0_i32, %c0_i32_0 : i32, i32
  }
  func.func @transform_2(%arg0: i32, %arg1: i32) -> (i32, i32) {
    %c0_i32 = arith.constant 0 : i32
    %c0_i32_0 = arith.constant 0 : i32
    %c0_i32_1 = arith.constant 0 : i32
    return %c0_i32, %c0_i32_0 : i32, i32
  }
  func.func @transform_3(%arg0: i32, %arg1: i32) -> (i32, i32) {
    %c0_i32 = arith.constant 0 : i32
    %c0_i32_0 = arith.constant 0 : i32
    return %arg0, %c0_i32 : i32, i32
  }
}

module attributes {stable_mosaic.version = 11 : i64} {
  func.func @kernel(%arg0: i32, %arg1: i32, %arg2: memref<128x256xbf16, #tpu.memory_space<vmem>>, %arg3: memref<256x128xbf16, #tpu.memory_space<vmem>>, %arg4: memref<1x128xf32, #tpu.memory_space<vmem>>, %arg5: memref<128x128xbf16, #tpu.memory_space<vmem>>, %arg6: memref<128x128xf32, #tpu.memory_space<vmem>>) attributes {dimension_semantics = [#tpu.dimension_semantics<parallel>, #tpu.dimension_semantics<arbitrary>], iteration_bounds = array<i64: 1, 1>, scalar_prefetch = 0 : i64, scratch_operands = 0 : i64, tpu.core_type = #tpu.core_type<tc>, window_params = [{transform_indices = @transform_0, window_bounds = array<i64: 128, 256>}, {pipeline_mode = #tpu.pipeline_mode<synchronous>, transform_indices = @transform_1, window_bounds = array<i64: 256, 128>}, {pipeline_mode = #tpu.pipeline_mode<synchronous>, transform_indices = @transform_2, window_bounds = array<i64: 1, 128>}, {transform_indices = @transform_3, window_bounds = array<i64: 128, 128>}, {transform_indices = @transform_4, window_bounds = array<i64: 128, 128>}]} {
    %c0_i32 = arith.constant 0 : i32
    %0 = arith.cmpi eq, %arg1, %c0_i32 : i32
    %1 = arith.extui %0 : i1 to i32
    %c0_i32_0 = arith.constant 0 : i32
    %2 = arith.cmpi ne, %1, %c0_i32_0 : i32
    scf.if %2 {
      %cst_9 = arith.constant 0.000000e+00 : f32
      %15 = vector.broadcast %cst_9 : f32 to vector<128x128xf32>
      %c0_10 = arith.constant 0 : index
      %c0_11 = arith.constant 0 : index
      %16 = vector.load %arg6[%c0_10, %c0_11] : memref<128x128xf32, #tpu.memory_space<vmem>>, vector<128x128xf32>
      tpu.vector_store %arg6[%c0_10, %c0_11], %15 {strides = array<i32>} : memref<128x128xf32, #tpu.memory_space<vmem>>, vector<128x128xf32>,
    } else {
    }
    %c256_i32 = arith.constant 256 : i32
    %3 = arith.muli %arg1, %c256_i32 : i32
    %4 = tpu.assume_multiple %3, 256 : i32
    %c0 = arith.constant 0 : index
    %c0_1 = arith.constant 0 : index
    %5 = vector.load %arg6[%c0, %c0_1] : memref<128x128xf32, #tpu.memory_space<vmem>>, vector<128x128xf32>
    %c0_2 = arith.constant 0 : index
    %c0_3 = arith.constant 0 : index
    %6 = vector.load %arg2[%c0_2, %c0_3] : memref<128x256xbf16, #tpu.memory_space<vmem>>, vector<128x256xbf16>
    %7 = arith.index_cast %4 : i32 to index
    %c0_4 = arith.constant 0 : index
    %8 = vector.load %arg3[%7, %c0_4] : memref<256x128xbf16, #tpu.memory_space<vmem>>, vector<256x128xbf16>
    %cst = arith.constant dense<0.000000e+00> : vector<128x128xf32>
    %9 = tpu.matmul %6, %8, %cst {dimension_numbers = #tpu.dot_dimension_numbers<[1], [0], [0], [1], [0, 0, 1, 1], [], []>} : vector<128x256xbf16>, vector<256x128xbf16>, vector<128x128xf32> -> vector<128x128xf32>
    %10 = arith.addf %5, %9 : vector<128x128xf32>
    %c0_5 = arith.constant 0 : index
    %c0_6 = arith.constant 0 : index
    %11 = vector.load %arg6[%c0_5, %c0_6] : memref<128x128xf32, #tpu.memory_space<vmem>>, vector<128x128xf32>
    tpu.vector_store %arg6[%c0_5, %c0_6], %10 {strides = array<i32>} : memref<128x128xf32, #tpu.memory_space<vmem>>, vector<128x128xf32>,
    %c0_i32_7 = arith.constant 0 : i32
    %12 = arith.cmpi eq, %arg1, %c0_i32_7 : i32
    %13 = arith.extui %12 : i1 to i32
    %c0_i32_8 = arith.constant 0 : i32
    %14 = arith.cmpi ne, %13, %c0_i32_8 : i32
    scf.if %14 {
      %c0_9 = arith.constant 0 : index
      %c0_10 = arith.constant 0 : index
      %15 = vector.load %arg6[%c0_9, %c0_10] : memref<128x128xf32, #tpu.memory_space<vmem>>, vector<128x128xf32>
      %c0_11 = arith.constant 0 : index
      %c0_12 = arith.constant 0 : index
      %16 = vector.load %arg4[%c0_11, %c0_12] : memref<1x128xf32, #tpu.memory_space<vmem>>, vector<1x128xf32>
      %17 = vector.broadcast %16 : vector<1x128xf32> to vector<128x128xf32>
      %18 = arith.addf %15, %17 : vector<128x128xf32>
      %c0_13 = arith.constant 0 : index
      %c0_14 = arith.constant 0 : index
      %19 = vector.load %arg5[%c0_13, %c0_14] : memref<128x128xbf16, #tpu.memory_space<vmem>>, vector<128x128xbf16>
      %20 = arith.extf %19 : vector<128x128xbf16> to vector<128x128xf32>
      %21 = arith.addf %18, %20 : vector<128x128xf32>
      %cst_15 = arith.constant 0.000000e+00 : f32
      %22 = vector.broadcast %cst_15 : f32 to vector<128x128xf32>
      %23 = arith.maximumf %21, %22 : vector<128x128xf32>
      %c0_16 = arith.constant 0 : index
      %c0_17 = arith.constant 0 : index
      %24 = vector.load %arg6[%c0_16, %c0_17] : memref<128x128xf32, #tpu.memory_space<vmem>>, vector<128x128xf32>
      tpu.vector_store %arg6[%c0_16, %c0_17], %23 {strides = array<i32>} : memref<128x128xf32, #tpu.memory_space<vmem>>, vector<128x128xf32>,
    } else {
    }
    return
  }
  func.func @transform_0(%arg0: i32, %arg1: i32) -> (i32, i32) {
    %c0_i32 = arith.constant 0 : i32
    return %arg0, %arg1 : i32, i32
  }
  func.func @transform_1(%arg0: i32, %arg1: i32) -> (i32, i32) {
    %c0_i32 = arith.constant 0 : i32
    %c0_i32_0 = arith.constant 0 : i32
    %c0_i32_1 = arith.constant 0 : i32
    return %c0_i32, %c0_i32_0 : i32, i32
  }
  func.func @transform_2(%arg0: i32, %arg1: i32) -> (i32, i32) {
    %c0_i32 = arith.constant 0 : i32
    %c0_i32_0 = arith.constant 0 : i32
    %c0_i32_1 = arith.constant 0 : i32
    return %c0_i32, %c0_i32_0 : i32, i32
  }
  func.func @transform_3(%arg0: i32, %arg1: i32) -> (i32, i32) {
    %c0_i32 = arith.constant 0 : i32
    %c0_i32_0 = arith.constant 0 : i32
    return %arg0, %c0_i32 : i32, i32
  }
  func.func @transform_4(%arg0: i32, %arg1: i32) -> (i32, i32) {
    %c0_i32 = arith.constant 0 : i32
    %c0_i32_0 = arith.constant 0 : i32
    return %arg0, %c0_i32 : i32, i32
  }
}

</mosaic_0001>

<bundles_post_ra>
// kernel: basic_block_forward.2
= control target key start
LH: loop header
LB: loop body
LE: loop exit
PB: predicated region body
PF: predicated region fallthrough
CT: control target
= control target key end

     0   :  { %v797_v1 = vmov 0   ;;  %v463_v25 = vlaneseq  ;;  %s985_s1 = inlined_call_operand.vmem [shape: bf16[128,256], index: 1, kind: input, shape index: {}]   ;;  %s986_s0 = inlined_call_operand.vmem [shape: bf16[128,128], index: 0, kind: input, shape index: {}]   ;;  %s987_s2 = inlined_call_operand.vmem [shape: f32[1,256], index: 2, kind: input, shape index: {}]   ;;  %s988_s3 = inlined_call_operand.vmem [shape: bf16[128,256], index: 3, kind: output, shape index: {}]  }
   0x1   :  { %v765_v0 = vld [vmem:[%s985_s1 + $0x4] ss:$8 sps:$4 sm:$0xff]   ;;  %281 = vmatprep.mubr.bf16.mxu0 %v797_v1  ;;  %321 = vmatprep.mubr.bf16.mxu1 %v797_v1  ;;  %v767_v2 = vld [vmem:[%s985_s1] ss:$8 sps:$4 sm:$0xff]   ;;  %v768_v3 = vld [vmem:[%s985_s1 + $0x14] ss:$8 sps:$4 sm:$0xff]  }
   0x2   :  { %249 = vmatprep.subr.bf16.mxu0 %v765_v0  ;;  %748 = vmatprep.subr.bf16.mxu1 %v765_v0  ;;  %v770_v4 = vld [vmem:[%s985_s1 + $0x10] ss:$8 sps:$4 sm:$0xff]   ;;  %v771_v5 = vld [vmem:[%s985_s1 + $0x24] ss:$8 sps:$4 sm:$0xff]   ;;  %v773_v6 = vld [vmem:[%s985_s1 + $0x20] ss:$8 sps:$4 sm:$0xff]  }
   0x3   :  { %250 = vmatpush1.bf16.msra.mxu0 %v767_v2  ;;  %756 = vmatpush1.bf16.msra.mxu1 %v767_v2  ;;  %v774_v7 = vld [vmem:[%s985_s1 + $0x34] ss:$8 sps:$4 sm:$0xff]   ;;  %v776_v8 = vld [vmem:[%s985_s1 + $0x30] ss:$8 sps:$4 sm:$0xff]   ;;  %v777_v9 = vld [vmem:[%s985_s1 + $0x44] ss:$8 sps:$4 sm:$0xff]  }
   0x4   :  { %251 = vmatprep.subr.bf16.mxu0 %v768_v3  ;;  %749 = vmatprep.subr.bf16.mxu1 %v768_v3  ;;  %v779_v10 = vld [vmem:[%s985_s1 + $0x40] ss:$8 sps:$4 sm:$0xff]   ;;  %v780_v11 = vld [vmem:[%s985_s1 + $0x54] ss:$8 sps:$4 sm:$0xff]   ;;  %v782_v12 = vld [vmem:[%s985_s1 + $0x50] ss:$8 sps:$4 sm:$0xff]  }
   0x5   :  { %v783_v13 = vld [vmem:[%s985_s1 + $0x64] ss:$8 sps:$4 sm:$0xff]   ;;  %v785_v14 = vld [vmem:[%s985_s1 + $0x60] ss:$8 sps:$4 sm:$0xff]   ;;  %v786_v15 = vld [vmem:[%s985_s1 + $0x74] ss:$8 sps:$4 sm:$0xff]  }
   0x6   :  { %v788_v16 = vld [vmem:[%s985_s1 + $0x70] ss:$8 sps:$4 sm:$0xff]   ;;  %v789_v17 = vld [vmem:[%s986_s0] sm:$0xff]   ;;  %v791_v19 = vld [vmem:[%s986_s0 + $0x8] sm:$0xff]   ;;  %v464_v26 = vshrl.u32 %v463_v25, 7 }
   0x7   :  { %252 = vmatpush1.bf16.msra.mxu0 %v770_v4  ;;  %757 = vmatpush1.bf16.msra.mxu1 %v770_v4  ;;  %v790_v18 = vld [vmem:[%s986_s0 + $0x20] sm:$0xff]   ;;  %v792_v20 = vld [vmem:[%s986_s0 + $0x28] sm:$0xff]   ;;  %v793_v21 = vld [vmem:[%s986_s0 + $0x10] sm:$0xff]  }
   0x8   :  { %253 = vmatprep.subr.bf16.mxu0 %v771_v5  ;;  %750 = vmatprep.subr.bf16.mxu1 %v771_v5  ;;  %v794_v22 = vld [vmem:[%s986_s0 + $0x30] sm:$0xff]   ;;  %v795_v23 = vld [vmem:[%s986_s0 + $0x18] sm:$0xff]   ;;  %v469_v27 = vsub.s32 1, %v464_v26  ;;  %v461_v28 = vld [vmem:[%s987_s2] sm:$0x3]  ;;  %v465_v29 = vsub.s32 0, %v464_v26 }
   0x9   :  { %v796_v24 = vld [vmem:[%s986_s0 + $0x38] sm:$0xff]  }
   0xa   :  { %v901_v30 = vrot.slane %v461_v28, %v469_v27  ;;  %v903_v31 = vrot.slane %v461_v28, %v465_v29 }
   0xb   :  { %254 = vmatpush1.bf16.msra.mxu0 %v773_v6  ;;  %758 = vmatpush1.bf16.msra.mxu1 %v773_v6 }
   0xc   :  { %255 = vmatprep.subr.bf16.mxu0 %v774_v7  ;;  %751 = vmatprep.subr.bf16.mxu1 %v774_v7 }
   0xf   :  { %256 = vmatpush1.bf16.msra.mxu0 %v776_v8  ;;  %759 = vmatpush1.bf16.msra.mxu1 %v776_v8 }
  0x10   :  { %257 = vmatprep.subr.bf16.mxu0 %v777_v9  ;;  %752 = vmatprep.subr.bf16.mxu1 %v777_v9 }
  0x13   :  { %258 = vmatpush1.bf16.msra.mxu0 %v779_v10  ;;  %760 = vmatpush1.bf16.msra.mxu1 %v779_v10 }
  0x14   :  { %259 = vmatprep.subr.bf16.mxu0 %v780_v11  ;;  %753 = vmatprep.subr.bf16.mxu1 %v780_v11 }
  0x17   :  { %260 = vmatpush1.bf16.msra.mxu0 %v782_v12  ;;  %761 = vmatpush1.bf16.msra.mxu1 %v782_v12 }
  0x18   :  { %261 = vmatprep.subr.bf16.mxu0 %v783_v13  ;;  %754 = vmatprep.subr.bf16.mxu1 %v783_v13 }
  0x1b   :  { %262 = vmatpush1.bf16.msra.mxu0 %v785_v14  ;;  %762 = vmatpush1.bf16.msra.mxu1 %v785_v14 }
  0x1c   :  { %263 = vmatprep.subr.bf16.mxu0 %v786_v15  ;;  %755 = vmatprep.subr.bf16.mxu1 %v786_v15 }
  0x1f   :  { %264 = vmatpush1.bf16.msra.mxu0 %v788_v16  ;;  %763 = vmatpush1.bf16.msra.mxu1 %v788_v16 }
  0x22   :  { %282 = vmatmul.mubr.bf16.vlgmr.msra.gmra.mrb[0].mxu0 %v789_v17  ;;  %322 = vmatmul.mubr.bf16.vlgmr.msra.gmra.mrb[0].mxu1 %v790_v18 }
  0x23   :  { %291 = vmatprep.mubr.bf16.mxu0 %v797_v1  ;;  %331 = vmatprep.mubr.bf16.mxu1 %v797_v1 }
  0x2a   :  { %292 = vmatmul.mubr.bf16.gmra.mrb[4].mxu0 %v791_v19  ;;  %332 = vmatmul.mubr.bf16.gmra.mrb[4].mxu1 %v792_v20 }
  0x2b   :  { %301 = vmatprep.mubr.bf16.mxu0 %v797_v1  ;;  %341 = vmatprep.mubr.bf16.mxu1 %v797_v1 }
  0x32   :  { %302 = vmatmul.mubr.bf16.gmra.mrb[8].mxu0 %v793_v21  ;;  %342 = vmatmul.mubr.bf16.gmra.mrb[8].mxu1 %v794_v22 }
  0x33   :  { %311 = vmatprep.mubr.bf16.mxu0 %v797_v1  ;;  %351 = vmatprep.mubr.bf16.mxu1 %v797_v1 }
  0x3a   :  { %312 = vmatmul.mubr.bf16.gmra.mrb[12].mxu0 %v795_v23  ;;  %352 = vmatmul.mubr.bf16.gmra.mrb[12].mxu1 %v796_v24 }
  0xf5   :  { %v283_v32 = vpop.f32.mrb[0].mxu0  ;;  %v323_v33 = vpop.f32.mrb[0].mxu1 }
  0xf6   :  { %v285_v34 = vpop.f32.mrb[1].mxu0  ;;  %v325_v35 = vpop.f32.mrb[1].mxu1  ;;  %v473_v40 = vadd.f32 %v903_v31, %v283_v32  ;;  %v489_v41 = vadd.f32 %v903_v31, %v323_v33 }
  0xf7   :  { %v474_v36 = vadd.f32 %v901_v30, %v285_v34  ;;  %v490_v37 = vadd.f32 %v901_v30, %v325_v35  ;;  %v287_v38 = vpop.f32.mrb[2].mxu0  ;;  %v327_v39 = vpop.f32.mrb[2].mxu1 }
  0xf8   :  { %v289_v42 = vpop.f32.mrb[3].mxu0  ;;  %v329_v43 = vpop.f32.mrb[3].mxu1  ;;  %v475_v48 = vadd.f32 %v903_v31, %v287_v38  ;;  %v491_v49 = vadd.f32 %v903_v31, %v327_v39 }
  0xf9   :  { %v511_v44 = vmax.f32 %v474_v36, 0.0  ;;  %v527_v45 = vmax.f32 %v490_v37, 0.0  ;;  %v476_v46 = vadd.f32 %v901_v30, %v289_v42  ;;  %v492_v47 = vadd.f32 %v901_v30, %v329_v43 }
  0xfb   :  { %v732_v50 = vpack.c.bf16 %v511_v44, %v473_v40  ;;  %v740_v51 = vpack.c.bf16 %v527_v45, %v489_v41  ;;  %v513_v52 = vmax.f32 %v476_v46, 0.0  ;;  %v529_v53 = vmax.f32 %v492_v47, 0.0 }
  0xfd   :  { %670 = vst [vmem:[%s988_s3] sm:$0xff] %v732_v50  ;;  %678 = vst [vmem:[%s988_s3 + $0x40] sm:$0xff] %v740_v51  ;;  %v733_v54 = vpack.c.bf16 %v513_v52, %v475_v48  ;;  %v741_v55 = vpack.c.bf16 %v529_v53, %v491_v49  ;;  %v293_v56 = vpop.f32.mrb[4].mxu0  ;;  %v333_v57 = vpop.f32.mrb[4].mxu1 }
  0xfe   :  { %v295_v58 = vpop.f32.mrb[5].mxu0  ;;  %v335_v59 = vpop.f32.mrb[5].mxu1  ;;  %v477_v0 = vadd.f32 %v903_v31, %v293_v56  ;;  %v493_v1 = vadd.f32 %v903_v31, %v333_v57 }
  0xff   :  { %671 = vst [vmem:[%s988_s3 + $0x8] sm:$0xff] %v733_v54  ;;  %679 = vst [vmem:[%s988_s3 + $0x48] sm:$0xff] %v741_v55  ;;  %v478_v60 = vadd.f32 %v901_v30, %v295_v58  ;;  %v494_v61 = vadd.f32 %v901_v30, %v335_v59  ;;  %v297_v62 = vpop.f32.mrb[6].mxu0  ;;  %v337_v63 = vpop.f32.mrb[6].mxu1 }
 0x100   :  { %v299_v2 = vpop.f32.mrb[7].mxu0  ;;  %v339_v3 = vpop.f32.mrb[7].mxu1  ;;  %v479_v8 = vadd.f32 %v903_v31, %v297_v62  ;;  %v495_v9 = vadd.f32 %v903_v31, %v337_v63 }
 0x101   :  { %v515_v4 = vmax.f32 %v478_v60, 0.0  ;;  %v531_v5 = vmax.f32 %v494_v61, 0.0  ;;  %v480_v6 = vadd.f32 %v901_v30, %v299_v2  ;;  %v496_v7 = vadd.f32 %v901_v30, %v339_v3 }
 0x103   :  { %v734_v10 = vpack.c.bf16 %v515_v4, %v477_v0  ;;  %v742_v11 = vpack.c.bf16 %v531_v5, %v493_v1  ;;  %v517_v12 = vmax.f32 %v480_v6, 0.0  ;;  %v533_v13 = vmax.f32 %v496_v7, 0.0 }
 0x105   :  { %672 = vst [vmem:[%s988_s3 + $0x10] sm:$0xff] %v734_v10  ;;  %680 = vst [vmem:[%s988_s3 + $0x50] sm:$0xff] %v742_v11  ;;  %v735_v14 = vpack.c.bf16 %v517_v12, %v479_v8  ;;  %v743_v15 = vpack.c.bf16 %v533_v13, %v495_v9  ;;  %v303_v16 = vpop.f32.mrb[8].mxu0  ;;  %v343_v17 = vpop.f32.mrb[8].mxu1 }
 0x106   :  { %v305_v18 = vpop.f32.mrb[9].mxu0  ;;  %v345_v19 = vpop.f32.mrb[9].mxu1  ;;  %v481_v24 = vadd.f32 %v903_v31, %v303_v16  ;;  %v497_v25 = vadd.f32 %v903_v31, %v343_v17 }
 0x107   :  { %673 = vst [vmem:[%s988_s3 + $0x18] sm:$0xff] %v735_v14  ;;  %681 = vst [vmem:[%s988_s3 + $0x58] sm:$0xff] %v743_v15  ;;  %v482_v20 = vadd.f32 %v901_v30, %v305_v18  ;;  %v498_v21 = vadd.f32 %v901_v30, %v345_v19  ;;  %v307_v22 = vpop.f32.mrb[10].mxu0  ;;  %v347_v23 = vpop.f32.mrb[10].mxu1 }
 0x108   :  { %v309_v26 = vpop.f32.mrb[11].mxu0  ;;  %v349_v27 = vpop.f32.mrb[11].mxu1  ;;  %v483_v34 = vadd.f32 %v903_v31, %v307_v22  ;;  %v499_v35 = vadd.f32 %v903_v31, %v347_v23 }
 0x109   :  { %v519_v28 = vmax.f32 %v482_v20, 0.0  ;;  %v535_v29 = vmax.f32 %v498_v21, 0.0  ;;  %v484_v32 = vadd.f32 %v901_v30, %v309_v26  ;;  %v500_v33 = vadd.f32 %v901_v30, %v349_v27 }
 0x10b   :  { %v736_v36 = vpack.c.bf16 %v519_v28, %v481_v24  ;;  %v744_v37 = vpack.c.bf16 %v535_v29, %v497_v25  ;;  %v521_v38 = vmax.f32 %v484_v32, 0.0  ;;  %v537_v39 = vmax.f32 %v500_v33, 0.0 }
 0x10d   :  { %674 = vst [vmem:[%s988_s3 + $0x20] sm:$0xff] %v736_v36  ;;  %682 = vst [vmem:[%s988_s3 + $0x60] sm:$0xff] %v744_v37  ;;  %v737_v40 = vpack.c.bf16 %v521_v38, %v483_v34  ;;  %v745_v41 = vpack.c.bf16 %v537_v39, %v499_v35  ;;  %v313_v42 = vpop.f32.mrb[12].mxu0  ;;  %v353_v43 = vpop.f32.mrb[12].mxu1 }
 0x10e   :  { %v315_v44 = vpop.f32.mrb[13].mxu0  ;;  %v355_v45 = vpop.f32.mrb[13].mxu1  ;;  %v485_v50 = vadd.f32 %v903_v31, %v313_v42  ;;  %v501_v51 = vadd.f32 %v903_v31, %v353_v43 }
 0x10f   :  { %675 = vst [vmem:[%s988_s3 + $0x28] sm:$0xff] %v737_v40  ;;  %683 = vst [vmem:[%s988_s3 + $0x68] sm:$0xff] %v745_v41  ;;  %v486_v46 = vadd.f32 %v901_v30, %v315_v44  ;;  %v502_v47 = vadd.f32 %v901_v30, %v355_v45  ;;  %v317_v48 = vpop.f32.mrb[14].mxu0  ;;  %v357_v49 = vpop.f32.mrb[14].mxu1 }
 0x110   :  { %v319_v52 = vpop.f32.mrb[15].mxu0  ;;  %v359_v53 = vpop.f32.mrb[15].mxu1  ;;  %v487_v58 = vadd.f32 %v903_v31, %v317_v48  ;;  %v503_v59 = vadd.f32 %v903_v31, %v357_v49 }
 0x111   :  { %v523_v54 = vmax.f32 %v486_v46, 0.0  ;;  %v539_v55 = vmax.f32 %v502_v47, 0.0  ;;  %v488_v56 = vadd.f32 %v901_v30, %v319_v52  ;;  %v504_v57 = vadd.f32 %v901_v30, %v359_v53 }
 0x113   :  { %v738_v60 = vpack.c.bf16 %v523_v54, %v485_v50  ;;  %v746_v61 = vpack.c.bf16 %v539_v55, %v501_v51  ;;  %v525_v62 = vmax.f32 %v488_v56, 0.0  ;;  %v541_v63 = vmax.f32 %v504_v57, 0.0 }
 0x115   :  { %676 = vst [vmem:[%s988_s3 + $0x30] sm:$0xff] %v738_v60  ;;  %684 = vst [vmem:[%s988_s3 + $0x70] sm:$0xff] %v746_v61  ;;  %v739_v0 = vpack.c.bf16 %v525_v62, %v487_v58  ;;  %v747_v1 = vpack.c.bf16 %v541_v63, %v503_v59 }
 0x117   :  { %677 = vst [vmem:[%s988_s3 + $0x38] sm:$0xff] %v739_v0  ;;  %685 = vst [vmem:[%s988_s3 + $0x78] sm:$0xff] %v747_v1 }

// kernel: basic_block_forward.3
= control target key start
LH: loop header
LB: loop body
LE: loop exit
PB: predicated region body
PF: predicated region fallthrough
CT: control target
= control target key end

     0   :  { %s1083_s0 = inlined_call_operand.vmem [shape: bf16[128,256], index: 0, kind: input, shape index: {}]   ;;  %s1084_s1 = inlined_call_operand.vmem [shape: bf16[256,128], index: 1, kind: input, shape index: {}]   ;;  %s1085_s2 = inlined_call_operand.vmem [shape: f32[1,128], index: 2, kind: input, shape index: {}]   ;;  %s1086_s3 = inlined_call_operand.vmem [shape: bf16[128,256], index: 3, kind: input, shape index: {}]   ;;  %s1087_s4 = inlined_call_operand.hbm [shape: f32[128,128], index: 4, kind: output, shape index: {}]  }
   0x1   :  { %v814_v0 = vld [vmem:[%s1084_s1 + $0x40] sm:$0xff]   ;;  %v816_v2 = vld [vmem:[%s1084_s1 + $0x48] sm:$0xff]   ;;  %v818_v4 = vld [vmem:[%s1084_s1 + $0x50] sm:$0xff]  }
   0x2   :  { %v815_v1 = vld [vmem:[%s1084_s1] sm:$0xff]   ;;  %730 = vmatprep.subr.bf16.mxu0 %v814_v0  ;;  %794 = vmatprep.subr.bf16.mxu1 %v814_v0  ;;  %v817_v3 = vld [vmem:[%s1084_s1 + $0x8] sm:$0xff]   ;;  %v819_v5 = vld [vmem:[%s1084_s1 + $0x10] sm:$0xff]  }
   0x3   :  { %731 = vmatpush3.bf16.msra.mxu0 %v815_v1  ;;  %802 = vmatpush3.bf16.msra.mxu1 %v815_v1  ;;  %v820_v6 = vld [vmem:[%s1084_s1 + $0x58] sm:$0xff]   ;;  %v822_v8 = vld [vmem:[%s1084_s1 + $0x60] sm:$0xff]   ;;  %v824_v10 = vld [vmem:[%s1084_s1 + $0x68] sm:$0xff]  }
   0x4   :  { %732 = vmatprep.subr.bf16.mxu0 %v816_v2  ;;  %795 = vmatprep.subr.bf16.mxu1 %v816_v2  ;;  %v821_v7 = vld [vmem:[%s1084_s1 + $0x18] sm:$0xff]   ;;  %v823_v9 = vld [vmem:[%s1084_s1 + $0x20] sm:$0xff]   ;;  %v825_v13 = vld [vmem:[%s1084_s1 + $0x28] sm:$0xff]  }
   0x5   :  { %v832_v11 = vld [vmem:[%s1083_s0 + $0x4] ss:$8 sps:$4 sm:$0xff]   ;;  %v826_v14 = vld [vmem:[%s1084_s1 + $0x70] sm:$0xff]   ;;  %v828_v16 = vld [vmem:[%s1084_s1 + $0x78] sm:$0xff]  }
   0x6   :  { %v835_v12 = vld [vmem:[%s1083_s0 + $0x44] ss:$8 sps:$4 sm:$0xff]   ;;  %417 = vmatprep.mubr.bf16.mxu0 %v832_v11  ;;  %v827_v15 = vld [vmem:[%s1084_s1 + $0x30] sm:$0xff]  }
   0x7   :  { %733 = vmatpush3.bf16.msra.mxu0 %v817_v3  ;;  %803 = vmatpush3.bf16.msra.mxu1 %v817_v3 }
   0x8   :  { %734 = vmatprep.subr.bf16.mxu0 %v818_v4  ;;  %796 = vmatprep.subr.bf16.mxu1 %v818_v4 }
   0x9   :  { %449 = vmatprep.mubr.bf16.mxu1 %v835_v12 }
   0xb   :  { %735 = vmatpush3.bf16.msra.mxu0 %v819_v5  ;;  %804 = vmatpush3.bf16.msra.mxu1 %v819_v5 }
   0xc   :  { %736 = vmatprep.subr.bf16.mxu0 %v820_v6  ;;  %797 = vmatprep.subr.bf16.mxu1 %v820_v6 }
   0xf   :  { %737 = vmatpush3.bf16.msra.mxu0 %v821_v7  ;;  %805 = vmatpush3.bf16.msra.mxu1 %v821_v7 }
  0x10   :  { %738 = vmatprep.subr.bf16.mxu0 %v822_v8  ;;  %798 = vmatprep.subr.bf16.mxu1 %v822_v8 }
  0x13   :  { %739 = vmatpush3.bf16.msra.mxu0 %v823_v9  ;;  %806 = vmatpush3.bf16.msra.mxu1 %v823_v9 }
  0x14   :  { %740 = vmatprep.subr.bf16.mxu0 %v824_v10  ;;  %799 = vmatprep.subr.bf16.mxu1 %v824_v10 }
  0x17   :  { %741 = vmatpush3.bf16.msra.mxu0 %v825_v13  ;;  %807 = vmatpush3.bf16.msra.mxu1 %v825_v13 }
  0x18   :  { %742 = vmatprep.subr.bf16.mxu0 %v826_v14  ;;  %800 = vmatprep.subr.bf16.mxu1 %v826_v14 }
  0x19   :  { %9 = vsyncpa [#allocation4], 0  ;;  %v829_v17 = vld [vmem:[%s1084_s1 + $0x38] sm:$0xff]   ;;  %v830_v18 = vld [vmem:[%s1083_s0] ss:$8 sps:$4 sm:$0xff]  }
  0x1a   :  { %v833_v19 = vld [vmem:[%s1083_s0 + $0x40] ss:$8 sps:$4 sm:$0xff]   ;;  %v836_v20 = vld [vmem:[%s1083_s0 + $0x14] ss:$8 sps:$4 sm:$0xff]   ;;  %v840_v22 = vld [vmem:[%s1083_s0 + $0x10] ss:$8 sps:$4 sm:$0xff]  }
  0x1b   :  { %743 = vmatpush3.bf16.msra.mxu0 %v827_v15  ;;  %808 = vmatpush3.bf16.msra.mxu1 %v827_v15  ;;  %v838_v21 = vld [vmem:[%s1083_s0 + $0x54] ss:$8 sps:$4 sm:$0xff]   ;;  %v841_v23 = vld [vmem:[%s1083_s0 + $0x50] ss:$8 sps:$4 sm:$0xff]   ;;  %v842_v24 = vld [vmem:[%s1083_s0 + $0x24] ss:$8 sps:$4 sm:$0xff]  }
  0x1c   :  { %744 = vmatprep.subr.bf16.mxu0 %v828_v16  ;;  %801 = vmatprep.subr.bf16.mxu1 %v828_v16  ;;  %v844_v25 = vld [vmem:[%s1083_s0 + $0x64] ss:$8 sps:$4 sm:$0xff]   ;;  %v846_v26 = vld [vmem:[%s1083_s0 + $0x20] ss:$8 sps:$4 sm:$0xff]   ;;  %v848_v28 = vld [vmem:[%s1083_s0 + $0x34] ss:$8 sps:$4 sm:$0xff]  }
  0x1d   :  { %v847_v27 = vld [vmem:[%s1083_s0 + $0x60] ss:$8 sps:$4 sm:$0xff]   ;;  %v850_v29 = vld [vmem:[%s1083_s0 + $0x74] ss:$8 sps:$4 sm:$0xff]   ;;  %v852_v30 = vld [vmem:[%s1083_s0 + $0x30] ss:$8 sps:$4 sm:$0xff]  }
  0x1e   :  { %v853_v31 = vld [vmem:[%s1083_s0 + $0x70] ss:$8 sps:$4 sm:$0xff]   ;;  %v33_v32 = vld [vmem:[%s1086_s3] sm:$0xf]  ;;  %v35_v33 = vld [vmem:[%s1086_s3 + $0x8] sm:$0xf] }
  0x1f   :  { %745 = vmatpush3.bf16.msra.mxu0 %v829_v17  ;;  %809 = vmatpush3.bf16.msra.mxu1 %v829_v17  ;;  %v49_v34 = vld [vmem:[%s1086_s3 + $0x40] sm:$0xf]  ;;  %34 = vst [vmem:[#allocation2] sm:$0xf] %v33_v32  ;;  %36 = vst [vmem:[#allocation2 + $0x4] sm:$0xf] %v35_v33 }
  0x20   :  { %50 = vst [vmem:[#allocation2 + $0x20] sm:$0xf] %v49_v34  ;;  %v51_v35 = vld [vmem:[%s1086_s3 + $0x48] sm:$0xf]  ;;  %v37_v36 = vld [vmem:[%s1086_s3 + $0x10] sm:$0xf] }
  0x21   :  { %52 = vst [vmem:[#allocation2 + $0x24] sm:$0xf] %v51_v35  ;;  %v39_v37 = vld [vmem:[%s1086_s3 + $0x18] sm:$0xf]  ;;  %38 = vst [vmem:[#allocation2 + $0x8] sm:$0xf] %v37_v36 }
  0x22   :  { %418 = vmatmul.mubr.bf16.vlgmr.msra.gmra.mrb[0].mxu0 %v830_v18  ;;  %450 = vmatmul.mubr.bf16.vlgmr.msra.gmra.mrb[0].mxu1 %v833_v19  ;;  %40 = vst [vmem:[#allocation2 + $0xc] sm:$0xf] %v39_v37  ;;  %v53_v38 = vld [vmem:[%s1086_s3 + $0x50] sm:$0xf]  ;;  %v55_v39 = vld [vmem:[%s1086_s3 + $0x58] sm:$0xf] }
  0x23   :  { %425 = vmatprep.mubr.bf16.mxu0 %v836_v20  ;;  %457 = vmatprep.mubr.bf16.mxu1 %v838_v21  ;;  %54 = vst [vmem:[#allocation2 + $0x28] sm:$0xf] %v53_v38  ;;  %56 = vst [vmem:[#allocation2 + $0x2c] sm:$0xf] %v55_v39  ;;  %v41_v40 = vld [vmem:[%s1086_s3 + $0x20] sm:$0xf] }
  0x24   :  { %42 = vst [vmem:[#allocation2 + $0x10] sm:$0xf] %v41_v40  ;;  %v43_v41 = vld [vmem:[%s1086_s3 + $0x28] sm:$0xf]  ;;  %v57_v42 = vld [vmem:[%s1086_s3 + $0x60] sm:$0xf] }
  0x25   :  { %v59_v43 = vld [vmem:[%s1086_s3 + $0x68] sm:$0xf]  ;;  %44 = vst [vmem:[#allocation2 + $0x14] sm:$0xf] %v43_v41  ;;  %58 = vst [vmem:[#allocation2 + $0x30] sm:$0xf] %v57_v42 }
  0x26   :  { %60 = vst [vmem:[#allocation2 + $0x34] sm:$0xf] %v59_v43  ;;  %v45_v44 = vld [vmem:[%s1086_s3 + $0x30] sm:$0xf]  ;;  %v47_v45 = vld [vmem:[%s1086_s3 + $0x38] sm:$0xf] }
  0x27   :  { %v61_v46 = vld [vmem:[%s1086_s3 + $0x70] sm:$0xf]  ;;  %46 = vst [vmem:[#allocation2 + $0x18] sm:$0xf] %v45_v44  ;;  %48 = vst [vmem:[#allocation2 + $0x1c] sm:$0xf] %v47_v45 }
  0x28   :  { %62 = vst [vmem:[#allocation2 + $0x38] sm:$0xf] %v61_v46  ;;  %v63_v47 = vld [vmem:[%s1086_s3 + $0x78] sm:$0xf]  ;;  %v692_v50 = vld [vmem:[#allocation2] sm:$0xff]  }
  0x29   :  { %64 = vst [vmem:[#allocation2 + $0x3c] sm:$0xf] %v63_v47  ;;  %v726_v51 = vld [vmem:[#allocation2 + $0x20] sm:$0xff]   ;;  %v693_v59 = vunpack.c.l.bf16 %v692_v50  ;;  %v694_v1 = vunpack.c.h.bf16 %v692_v50  ;;  %v723_v17 = vld [vmem:[#allocation2 + $0x8] sm:$0xff]  }
  0x2a   :  { %426 = vmatmul.mubr.bf16.gmra.mrb[4].mxu0 %v840_v22  ;;  %458 = vmatmul.mubr.bf16.gmra.mrb[4].mxu1 %v841_v23  ;;  %v1053_v58 = vld [vmem:[%s1085_s2] ss:$0 sm:$0xff]  ;;  %v709_v60 = vunpack.c.l.bf16 %v726_v51  ;;  %v710_v2 = vunpack.c.h.bf16 %v726_v51  ;;  %v727_v18 = vld [vmem:[#allocation2 + $0x28] sm:$0xff]   ;;  %s878_s2 = smov [#allocation3]  }
  0x2b   :  { %433 = vmatprep.mubr.bf16.mxu0 %v842_v24  ;;  %465 = vmatprep.mubr.bf16.mxu1 %v844_v25  ;;  %v714_v32 = vunpack.c.h.bf16 %v727_v18  ;;  %s641_s3 = sshll.u32 %s878_s2, 4  ;;  %s642_s3 = int_to_ptr.vmem [resolvable:$true] %s641_s3 }
  0x2c   :  { %v724_v39 = vld [vmem:[#allocation2 + $0x10] sm:$0xff]   ;;  %s854_s6 = scalar_lea.vmem %s642_s3, 2048  ;;  %p859_p1 = scmp.lt.s32.totalorder %s642_s3, %s642_s3 }
  0x2d   :  { %v728_v40 = vld [vmem:[#allocation2 + $0x30] sm:$0xff]   ;;  %p855_p0 = scmp.ne.s32.totalorder %s642_s3, %s854_s6  ;;  %p860_p2 = scmp.lt.s32.totalorder %s854_s6, %s854_s6 }
  0x2f   :  { %p861_p3 = por %p860_p2, %p859_p1 }
  0x31   :  { %p862_p4 = pnand %p861_p3, %p855_p0 }
  0x32   :  { %434 = vmatmul.mubr.bf16.gmra.mrb[8].mxu0 %v846_v26  ;;  %466 = vmatmul.mubr.bf16.gmra.mrb[8].mxu1 %v847_v27 }
  0x33   :  { %441 = vmatprep.mubr.bf16.mxu0 %v848_v28  ;;  %473 = vmatprep.mubr.bf16.mxu1 %v850_v29  ;;  %v697_v29 = vunpack.c.l.bf16 %v723_v17 }
  0x3a   :  { %442 = vmatmul.mubr.bf16.gmra.mrb[12].mxu0 %v852_v30  ;;  %474 = vmatmul.mubr.bf16.gmra.mrb[12].mxu1 %v853_v31  ;;  %v713_v30 = vunpack.c.l.bf16 %v727_v18  ;;  %v698_v31 = vunpack.c.h.bf16 %v723_v17 }
  0xf5   :  { %v746_v48 = vpop.f32.mrb[0].mxu0  ;;  %v770_v49 = vpop.f32.mrb[0].mxu1 }
  0xf6   :  { %v747_v52 = vpop.f32.mrb[1].mxu0  ;;  %v771_v53 = vpop.f32.mrb[1].mxu1 }
  0xf7   :  { %v748_v54 = vadd.f32 %v747_v52, %v746_v48  ;;  %v772_v55 = vadd.f32 %v771_v53, %v770_v49  ;;  %v749_v56 = vpop.f32.mrb[2].mxu0  ;;  %v773_v57 = vpop.f32.mrb[2].mxu1  ;;  %v701_v53 = vunpack.c.l.bf16 %v724_v39 }
  0xf8   :  { %v750_v61 = vpop.f32.mrb[3].mxu0  ;;  %v774_v62 = vpop.f32.mrb[3].mxu1 }
  0xf9   :  { %v751_v63 = vadd.f32 %v750_v61, %v749_v56  ;;  %v775_v0 = vadd.f32 %v774_v62, %v773_v57  ;;  %v540_v3 = vadd.f32 %v748_v54, %v1053_v58  ;;  %v548_v4 = vadd.f32 %v772_v55, %v1053_v58 }
  0xfa   :  { %v717_v54 = vunpack.c.l.bf16 %v728_v40 }
  0xfb   :  { %v588_v5 = vadd.f32 %v693_v59, %v540_v3  ;;  %v596_v6 = vadd.f32 %v709_v60, %v548_v4  ;;  %v541_v7 = vadd.f32 %v751_v63, %v1053_v58  ;;  %v549_v8 = vadd.f32 %v775_v0, %v1053_v58 }
  0xfc   :  { %v702_v0 = vunpack.c.h.bf16 %v724_v39 }
  0xfd   :  { %v752_v9 = vpop.f32.mrb[4].mxu0  ;;  %v776_v10 = vpop.f32.mrb[4].mxu1  ;;  %v604_v13 = vmax.f32 %v588_v5, 0.0  ;;  %v612_v14 = vmax.f32 %v596_v6, 0.0  ;;  %v589_v15 = vadd.f32 %v694_v1, %v541_v7  ;;  %v597_v16 = vadd.f32 %v710_v2, %v549_v8  ;;  %v725_v6 = vld [vmem:[#allocation2 + $0x18] sm:$0xff]  }
  0xfe   :  { %v753_v11 = vpop.f32.mrb[5].mxu0  ;;  %v777_v12 = vpop.f32.mrb[5].mxu1  ;;  %v718_v1 = vunpack.c.h.bf16 %v728_v40  ;;  %v729_v7 = vld [vmem:[#allocation2 + $0x38] sm:$0xff]  }
  0xff   :  { %v755_v19 = vpop.f32.mrb[6].mxu0  ;;  %v779_v20 = vpop.f32.mrb[6].mxu1  ;;  %v754_v21 = vadd.f32 %v753_v11, %v752_v9  ;;  %v778_v22 = vadd.f32 %v777_v12, %v776_v10  ;;  %620 = vst [vmem:[#allocation3] sm:$0xff] %v604_v13  ;;  %628 = vst [vmem:[#allocation3 + $0x40] sm:$0xff] %v612_v14  ;;  %v605_v25 = vmax.f32 %v589_v15, 0.0  ;;  %v613_v26 = vmax.f32 %v597_v16, 0.0 }
 0x100   :  { %v756_v23 = vpop.f32.mrb[7].mxu0  ;;  %v780_v24 = vpop.f32.mrb[7].mxu1 }
 0x101   :  { %v757_v27 = vadd.f32 %v756_v23, %v755_v19  ;;  %v781_v28 = vadd.f32 %v780_v24, %v779_v20  ;;  %621 = vst [vmem:[#allocation3 + $0x8] sm:$0xff] %v605_v25  ;;  %629 = vst [vmem:[#allocation3 + $0x48] sm:$0xff] %v613_v26  ;;  %v542_v33 = vadd.f32 %v754_v21, %v1053_v58  ;;  %v705_v20 = vunpack.c.l.bf16 %v725_v6 }
 0x102   :  { %v550_v34 = vadd.f32 %v778_v22, %v1053_v58  ;;  %v721_v21 = vunpack.c.l.bf16 %v729_v7 }
 0x103   :  { %v543_v35 = vadd.f32 %v757_v27, %v1053_v58  ;;  %v551_v36 = vadd.f32 %v781_v28, %v1053_v58  ;;  %v590_v41 = vadd.f32 %v697_v29, %v542_v33  ;;  %v706_v28 = vunpack.c.h.bf16 %v725_v6 }
 0x104   :  { %v598_v42 = vadd.f32 %v713_v30, %v550_v34  ;;  %v722_v29 = vunpack.c.h.bf16 %v729_v7 }
 0x105   :  { %v758_v37 = vpop.f32.mrb[8].mxu0  ;;  %v782_v38 = vpop.f32.mrb[8].mxu1  ;;  %v591_v45 = vadd.f32 %v698_v31, %v543_v35  ;;  %v599_v46 = vadd.f32 %v714_v32, %v551_v36  ;;  %v606_v51 = vmax.f32 %v590_v41, 0.0 }
 0x106   :  { %v759_v43 = vpop.f32.mrb[9].mxu0  ;;  %v783_v44 = vpop.f32.mrb[9].mxu1  ;;  %v614_v52 = vmax.f32 %v598_v42, 0.0 }
 0x107   :  { %v760_v47 = vadd.f32 %v759_v43, %v758_v37  ;;  %v784_v48 = vadd.f32 %v783_v44, %v782_v38  ;;  %v761_v49 = vpop.f32.mrb[10].mxu0  ;;  %v785_v50 = vpop.f32.mrb[10].mxu1  ;;  %v607_v57 = vmax.f32 %v591_v45, 0.0  ;;  %v615_v59 = vmax.f32 %v599_v46, 0.0  ;;  %622 = vst [vmem:[#allocation3 + $0x10] sm:$0xff] %v606_v51 }
 0x108   :  { %v762_v55 = vpop.f32.mrb[11].mxu0  ;;  %v786_v56 = vpop.f32.mrb[11].mxu1  ;;  %630 = vst [vmem:[#allocation3 + $0x50] sm:$0xff] %v614_v52 }
 0x109   :  { %v763_v60 = vadd.f32 %v762_v55, %v761_v49  ;;  %v787_v61 = vadd.f32 %v786_v56, %v785_v50  ;;  %623 = vst [vmem:[#allocation3 + $0x18] sm:$0xff] %v607_v57  ;;  %631 = vst [vmem:[#allocation3 + $0x58] sm:$0xff] %v615_v59  ;;  %v544_v62 = vadd.f32 %v760_v47, %v1053_v58 }
 0x10a   :  { %v552_v63 = vadd.f32 %v784_v48, %v1053_v58 }
 0x10b   :  { %v592_v2 = vadd.f32 %v701_v53, %v544_v62  ;;  %v545_v8 = vadd.f32 %v763_v60, %v1053_v58  ;;  %v553_v9 = vadd.f32 %v787_v61, %v1053_v58 }
 0x10c   :  { %v600_v3 = vadd.f32 %v717_v54, %v552_v63 }
 0x10d   :  { %v764_v4 = vpop.f32.mrb[12].mxu0  ;;  %v788_v5 = vpop.f32.mrb[12].mxu1  ;;  %v608_v12 = vmax.f32 %v592_v2, 0.0  ;;  %v593_v18 = vadd.f32 %v702_v0, %v545_v8  ;;  %v601_v19 = vadd.f32 %v718_v1, %v553_v9 }
 0x10e   :  { %v765_v10 = vpop.f32.mrb[13].mxu0  ;;  %v789_v11 = vpop.f32.mrb[13].mxu1  ;;  %v616_v13 = vmax.f32 %v600_v3, 0.0 }
 0x10f   :  { %v766_v14 = vadd.f32 %v765_v10, %v764_v4  ;;  %v790_v15 = vadd.f32 %v789_v11, %v788_v5  ;;  %v767_v16 = vpop.f32.mrb[14].mxu0  ;;  %v791_v17 = vpop.f32.mrb[14].mxu1  ;;  %624 = vst [vmem:[#allocation3 + $0x20] sm:$0xff] %v608_v12  ;;  %v609_v26 = vmax.f32 %v593_v18, 0.0  ;;  %v617_v27 = vmax.f32 %v601_v19, 0.0 }
 0x110   :  { %v768_v22 = vpop.f32.mrb[15].mxu0  ;;  %v792_v23 = vpop.f32.mrb[15].mxu1  ;;  %632 = vst [vmem:[#allocation3 + $0x60] sm:$0xff] %v616_v13 }
 0x111   :  { %v769_v24 = vadd.f32 %v768_v22, %v767_v16  ;;  %v793_v25 = vadd.f32 %v792_v23, %v791_v17  ;;  %v546_v30 = vadd.f32 %v766_v14, %v1053_v58  ;;  %v554_v31 = vadd.f32 %v790_v15, %v1053_v58  ;;  %625 = vst [vmem:[#allocation3 + $0x28] sm:$0xff] %v609_v26 }
 0x112   :  { %633 = vst [vmem:[#allocation3 + $0x68] sm:$0xff] %v617_v27 }
 0x113   :  { %v594_v32 = vadd.f32 %v705_v20, %v546_v30  ;;  %v602_v33 = vadd.f32 %v721_v21, %v554_v31  ;;  %v547_v34 = vadd.f32 %v769_v24, %v1053_v58  ;;  %v555_v35 = vadd.f32 %v793_v25, %v1053_v58 }
 0x115   :  { %v610_v36 = vmax.f32 %v594_v32, 0.0  ;;  %v618_v37 = vmax.f32 %v602_v33, 0.0  ;;  %v595_v38 = vadd.f32 %v706_v28, %v547_v34  ;;  %v603_v39 = vadd.f32 %v722_v29, %v555_v35 }
 0x117   :  { %626 = vst [vmem:[#allocation3 + $0x30] sm:$0xff] %v610_v36  ;;  %634 = vst [vmem:[#allocation3 + $0x70] sm:$0xff] %v618_v37  ;;  %v611_v40 = vmax.f32 %v595_v38, 0.0  ;;  %v619_v41 = vmax.f32 %v603_v39, 0.0 }
 0x119   :  { %627 = vst [vmem:[#allocation3 + $0x38] sm:$0xff] %v611_v40  ;;  %635 = vst [vmem:[#allocation3 + $0x78] sm:$0xff] %v619_v41 }
 0x11a   :  { %865 = shalt.err (!%p862_p4)
}
 0x11b   :  { %s866_s7 = scalar_lea.hbm %s1087_s4, 2048 }
 0x11c   :  { %p867_p5 = scmp.ne.s32.totalorder %s1087_s4, %s866_s7  ;;  %p870_p6 = scmp.lt.u32.totalorder %s866_s7, %s1087_s4 }
 0x11e   :  { %p872_p7 = pnand %p870_p6, %p867_p5 }
 0x120   :  { %875 = shalt.err (!%p872_p7)
}
 0x121   :  { %s879_s12 = smov 128   ;;  %s880_s13 = smov 8  }
 0x122   :  { %647 = dma.vmem_to_hbm [thread:$0]  %s642_s3, 2048, %s1087_s4, [#allocation4], %s879_s12, %s879_s12, %s880_s13  }
 0x123   :  { %876 = dma.done.wait [#allocation4], 2048  }
 0x124   :  { %877 = vsyncadd [#allocation4], 4294965248 }
 0x125   :  { %651 = vsyncpa [#allocation4], 1 }

</bundles_post_ra>
